<compile_context>
chip_gen: v7x
topology: tpu7x:2x2x1
jax: 0.10.0
libtpu: 0.0.40
codegen_flags: <defaults>
</compile_context>

<pallas_src>
import jax
import jax.numpy as jnp
from jax.experimental import pallas as pl
from jax.experimental.pallas import tpu as pltpu


INIT_UNIFORM_MAG = 0.1  # stands in for config.init_uniform_mag


def _gat_attention_kernel(mask_ref, x_ref, xk_ref, wq_ref, wk_ref, out_ref,
                          hacc_ref):
    """One pGraphAttentionLayer, tiled over the key-node axis.

    grid = (L, KB): L  = independent layers (heads)  -> "parallel"
                    KB = key-node blocks             -> "arbitrary" (reduction)

    mask_ref : (B, N, tk)     int8   (adj + I) > 0, key tile
    x_ref    : (B, N, Fin)    bf16   all query nodes (resident across the grid)
    xk_ref   : (B, tk, Fin)   bf16   key-node tile of the same activations
    wq_ref   : (1, Fin, Fout) bf16   this layer's Wq
    wk_ref   : (1, Fin, Fout) bf16   this layer's Wk (also projects h_prime)
    out_ref  : (1, B, N, Fout) f32
    hacc_ref : (B, N, Fin)    f32    attention @ x accumulator over key blocks
    """
    kb = pl.program_id(1)
    nkb = pl.num_programs(1)

    @pl.when(kb == 0)
    def _():
        hacc_ref[...] = jnp.zeros_like(hacc_ref)

    x = x_ref[...]
    xk = xk_ref[...]
    wq = wq_ref[0]
    wk = wk_ref[0]
    B, N, Fin = x.shape
    tk = xk.shape[1]
    Fout = wq.shape[1]

    # q over all queries, k over this key tile (bf16 operands, f32 accumulate).
    q = jnp.dot(x.reshape(B * N, Fin), wq,
                preferred_element_type=jnp.float32).reshape(B, N, Fout)
    k = jnp.dot(xk.reshape(B * tk, Fin), wk,
                preferred_element_type=jnp.float32).reshape(B, tk, Fout)

    s = jnp.einsum('bqd,bkd->bqk', q.astype(jnp.bfloat16),
                   k.astype(jnp.bfloat16),
                   preferred_element_type=jnp.float32)          # (B, N, tk)

    # F.softmax with implicit dim on a 3-D tensor -> dim=0 (batch axis).
    s = s - jnp.max(s, axis=0, keepdims=True)
    e0 = jnp.exp(s)
    s = e0 * pl.reciprocal(jnp.sum(e0, axis=0, keepdims=True), approx=True)

    # Masked softmax over queries (dim=1).  s is a softmax output in [0, 1] and
    # the mask diagonal is always set, so no max-subtraction pass is needed and
    # mask * exp(s) equals exp(where(mask, s, -9e15)) exactly (exp(-9e15) == 0).
    e1 = jnp.exp(s) * mask_ref[...].astype(jnp.float32)
    att = e1 * pl.reciprocal(jnp.sum(e1, axis=1, keepdims=True), approx=True)
    # TODO(synk): nn.Dropout on `att` is stochastic; identity in eval mode.

    # Accumulate attention @ inputs over key blocks.
    hacc_ref[...] += jnp.einsum('bqk,bkf->bqf', att.astype(jnp.bfloat16), xk,
                                preferred_element_type=jnp.float32)

    @pl.when(kb == nkb - 1)
    def _():
        hp = jnp.dot(hacc_ref[...].reshape(B * N, Fin).astype(jnp.bfloat16), wk,
                     preferred_element_type=jnp.float32).reshape(B, N, Fout)
        # Final per-layer softmax over dim=1; exact divide (these are the
        # probabilities the caller sees).
        hp = hp - jnp.max(hp, axis=1, keepdims=True)
        eo = jnp.exp(hp)
        out_ref[0] = (eo / jnp.sum(eo, axis=1, keepdims=True)).astype(out_ref.dtype)


def _pick_key_tile(n):
    # Whole key axis when small; otherwise a lane-dense 128-multiple tile.
    # VMEM budget per key block is ~2 double-buffered mask tiles (int8) plus a
    # few (B, N, tk) f32 score temporaries -- keep tk modest for v7x (64 MiB
    # physical VMEM) and slightly larger on v5e to amortize per-step overhead.
    if n <= 512:
        return n
    for tk in (512, 256, 128):
        if n % tk == 0:
            return tk
    return n  # fallback: whole key axis (must fit VMEM)


def _attention_layer(x_bf16, mask_i8, wq_stack, wk_stack, *, tk,
                     vmem_limit_bytes):
    """Runs L independent pGraphAttentionLayers sharing one adjacency mask."""
    L, Fin, Fout = wq_stack.shape
    B, N, _ = x_bf16.shape
    kb = N // tk
    return pl.pallas_call(
        _gat_attention_kernel,
        out_shape=jax.ShapeDtypeStruct((L, B, N, Fout), jnp.float32),
        grid=(L, kb),
        in_specs=[
            pl.BlockSpec((B, N, tk), lambda l, k: (0, 0, k)),      # mask key tile
            pl.BlockSpec((B, N, Fin), lambda l, k: (0, 0, 0)),     # x, all queries
            pl.BlockSpec((B, tk, Fin), lambda l, k: (0, k, 0)),    # x, key tile
            pl.BlockSpec((1, Fin, Fout), lambda l, k: (l, 0, 0)),  # Wq of layer l
            pl.BlockSpec((1, Fin, Fout), lambda l, k: (l, 0, 0)),  # Wk of layer l
        ],
        out_specs=pl.BlockSpec((1, B, N, Fout), lambda l, k: (l, 0, 0, 0)),
        scratch_shapes=[pltpu.VMEM((B, N, Fin), jnp.float32)],
        compiler_params=pltpu.CompilerParams(
            dimension_semantics=("parallel", "arbitrary"),
            vmem_limit_bytes=vmem_limit_bytes),
    )(mask_i8, x_bf16, x_bf16, wq_stack, wk_stack)


def init_gat_params(key, nfeat, nhid, nclass, nheads):
    params = {'attentions': [], 'out': {}}
    keys = jax.random.split(key, 3 * nheads + 3)

    def unif(k, shape):
        return jax.random.uniform(k, shape, jnp.float32,
                                  -INIT_UNIFORM_MAG, INIT_UNIFORM_MAG)

    for h in range(nheads):
        params['attentions'].append({
            'Wq': unif(keys[3 * h + 0], (nfeat, nhid)),
            'Wk': unif(keys[3 * h + 1], (nfeat, nhid)),
            'Wl': unif(keys[3 * h + 2], (nfeat, nhid)),  # unused in forward
        })
    params['out'] = {
        'Wq': unif(keys[-3], (nhid * nheads, nclass)),
        'Wk': unif(keys[-2], (nhid * nheads, nclass)),
        'Wl': unif(keys[-1], (nhid * nheads, nclass)),  # unused in forward
    }
    return params


def gat_forward(x, adj, params):
    # dropout1 / dropout2 / in-layer dropout are identity in eval mode.
    B, N, Fin = x.shape
    heads = params['attentions']
    nheads = len(heads)
    nhid = heads[0]['Wq'].shape[1]
    nclass = params['out']['Wq'].shape[1]

    tk = _pick_key_tile(N)
    vmem_limit = 48 * 1024 * 1024  # fits v7x's 64 MiB physical VMEM with headroom

    # (adj + I) > 0 computed once, shipped as int8: 4x less HBM traffic / VMEM
    # than the f32 adjacency, reused by every head and the output layer.
    eye = jnp.eye(N, dtype=adj.dtype)
    mask_i8 = ((adj + eye[None, :, :]) > 0).astype(jnp.int8)

    x_bf16 = x.astype(jnp.bfloat16)

    # All heads in one pallas_call: head-major weights (nheads, Fin, nhid); the
    # head axis is a "parallel" grid dim (both v7x TensorCores busy) and there
    # is no sub-128-lane weight slicing or concatenate inside the kernel.
    wq_h = jnp.stack([p['Wq'] for p in heads], axis=0).astype(jnp.bfloat16)
    wk_h = jnp.stack([p['Wk'] for p in heads], axis=0).astype(jnp.bfloat16)
    head_out = _attention_layer(x_bf16, mask_i8, wq_h, wk_h,
                                tk=tk, vmem_limit_bytes=vmem_limit)
    # torch.cat(..., dim=2): (nheads, B, N, nhid) -> (B, N, nheads*nhid).
    xcat = jnp.transpose(head_out, (1, 2, 0, 3)).reshape(B, N, nheads * nhid)

    # Output attention layer; class dim zero-padded to a lane-dense multiple of
    # 128 (padded columns contribute exactly 0 to q@k^T and to h_prime @ Wk).
    cpad = ((nclass + 127) // 128) * 128
    wq_o = jnp.pad(params['out']['Wq'], ((0, 0), (0, cpad - nclass)))
    wk_o = jnp.pad(params['out']['Wk'], ((0, 0), (0, cpad - nclass)))
    out = _attention_layer(xcat.astype(jnp.bfloat16), mask_i8,
                           wq_o[None].astype(jnp.bfloat16),
                           wk_o[None].astype(jnp.bfloat16),
                           tk=tk, vmem_limit_bytes=vmem_limit)
    # F.elu(softmax(...)) == softmax(...) since softmax output > 0: ELU elided.
    return out[0, :, :, :nclass]


if __name__ == "__main__":
    B, N = 2, 8
    nfeat, nhid, nclass, nheads = 16, 8, 4, 2
    dropout, alpha = 0.1, 0.2  # dropout=identity (eval); alpha (LeakyReLU) unused

    key = jax.random.PRNGKey(0)
    k_x, k_adj, k_w = jax.random.split(key, 3)

    x = jax.random.normal(k_x, (B, N, nfeat), jnp.float32)
    adj = (jax.random.uniform(k_adj, (B, N, N)) > 0.5).astype(jnp.float32)

    params = init_gat_params(k_w, nfeat, nhid, nclass, nheads)

    out = gat_forward(x, adj, params)
    jax.block_until_ready(out)
    assert out.shape == (B, N, nclass), out.shape
    assert out.dtype == jnp.float32
    print("KERNEL_OK")
</pallas_src>

<mosaic_0001>
module attributes {stable_mosaic.version = 11 : i64} {
  func.func @_gat_attention_kernel(%arg0: i32, %arg1: i32, %arg2: memref<2x8x8xi8, #tpu.memory_space<vmem>>, %arg3: memref<2x8x16xbf16, #tpu.memory_space<vmem>>, %arg4: memref<2x8x16xbf16, #tpu.memory_space<vmem>>, %arg5: memref<1x16x8xbf16, #tpu.memory_space<vmem>>, %arg6: memref<1x16x8xbf16, #tpu.memory_space<vmem>>, %arg7: memref<1x2x8x8xf32, #tpu.memory_space<vmem>>, %arg8: memref<2x8x16xf32, #tpu.memory_space<vmem>>) attributes {dimension_semantics = [#tpu.dimension_semantics<parallel>, #tpu.dimension_semantics<arbitrary>], iteration_bounds = array<i64: 2, 1>, scalar_prefetch = 0 : i64, scratch_operands = 1 : i64, tpu.core_type = #tpu.core_type<tc>, window_params = [{transform_indices = @transform_0, window_bounds = array<i64: 2, 8, 8>}, {pipeline_mode = #tpu.pipeline_mode<synchronous>, transform_indices = @transform_1, window_bounds = array<i64: 2, 8, 16>}, {transform_indices = @transform_2, window_bounds = array<i64: 2, 8, 16>}, {transform_indices = @transform_3, window_bounds = array<i64: 1, 16, 8>}, {transform_indices = @transform_4, window_bounds = array<i64: 1, 16, 8>}, {transform_indices = @transform_5, window_bounds = array<i64: 1, 2, 8, 8>}]} {
    %c0_i32 = arith.constant 0 : i32
    %0 = arith.cmpi eq, %arg1, %c0_i32 : i32
    %1 = arith.extui %0 : i1 to i32
    %c0_i32_0 = arith.constant 0 : i32
    %2 = arith.cmpi ne, %1, %c0_i32_0 : i32
    scf.if %2 {
      %cst_29 = arith.constant 0.000000e+00 : f32
      %45 = vector.broadcast %cst_29 : f32 to vector<2x8x16xf32>
      %c0_30 = arith.constant 0 : index
      %c0_31 = arith.constant 0 : index
      %c0_32 = arith.constant 0 : index
      %46 = vector.load %arg8[%c0_30, %c0_31, %c0_32] : memref<2x8x16xf32, #tpu.memory_space<vmem>>, vector<2x8x16xf32>
      tpu.vector_store %arg8[%c0_30, %c0_31, %c0_32], %45 {strides = array<i32>} : memref<2x8x16xf32, #tpu.memory_space<vmem>>, vector<2x8x16xf32>,
    } else {
    }
    %c0 = arith.constant 0 : index
    %c0_1 = arith.constant 0 : index
    %c0_2 = arith.constant 0 : index
    %3 = vector.load %arg3[%c0, %c0_1, %c0_2] : memref<2x8x16xbf16, #tpu.memory_space<vmem>>, vector<2x8x16xbf16>
    %c0_3 = arith.constant 0 : index
    %c0_4 = arith.constant 0 : index
    %c0_5 = arith.constant 0 : index
    %4 = vector.load %arg4[%c0_3, %c0_4, %c0_5] : memref<2x8x16xbf16, #tpu.memory_space<vmem>>, vector<2x8x16xbf16>
    %c0_6 = arith.constant 0 : index
    %c0_7 = arith.constant 0 : index
    %c0_8 = arith.constant 0 : index
    %5 = vector.load %arg5[%c0_6, %c0_7, %c0_8] : memref<1x16x8xbf16, #tpu.memory_space<vmem>>, vector<1x16x8xbf16>
    %6 = vector.shape_cast %5 : vector<1x16x8xbf16> to vector<16x8xbf16>
    %c0_9 = arith.constant 0 : index
    %c0_10 = arith.constant 0 : index
    %c0_11 = arith.constant 0 : index
    %7 = vector.load %arg6[%c0_9, %c0_10, %c0_11] : memref<1x16x8xbf16, #tpu.memory_space<vmem>>, vector<1x16x8xbf16>
    %8 = vector.shape_cast %7 : vector<1x16x8xbf16> to vector<16x8xbf16>
    %9 = vector.shape_cast %3 : vector<2x8x16xbf16> to vector<16x16xbf16>
    %cst = arith.constant dense<0.000000e+00> : vector<16x8xf32>
    %10 = tpu.matmul %9, %6, %cst {dimension_numbers = #tpu.dot_dimension_numbers<[1], [0], [0], [1], [0, 0, 1, 1], [], []>} : vector<16x16xbf16>, vector<16x8xbf16>, vector<16x8xf32> -> vector<16x8xf32>
    %11 = vector.shape_cast %10 : vector<16x8xf32> to vector<2x8x8xf32>
    %12 = vector.shape_cast %4 : vector<2x8x16xbf16> to vector<16x16xbf16>
    %cst_12 = arith.constant dense<0.000000e+00> : vector<16x8xf32>
    %13 = tpu.matmul %12, %8, %cst_12 {dimension_numbers = #tpu.dot_dimension_numbers<[1], [0], [0], [1], [0, 0, 1, 1], [], []>} : vector<16x16xbf16>, vector<16x8xbf16>, vector<16x8xf32> -> vector<16x8xf32>
    %14 = vector.shape_cast %13 : vector<16x8xf32> to vector<2x8x8xf32>
    %15 = arith.truncf %11 : vector<2x8x8xf32> to vector<2x8x8xbf16>
    %16 = arith.truncf %14 : vector<2x8x8xf32> to vector<2x8x8xbf16>
    "tpu.trace_start"() <{level = 10 : i32, message = "bqd,bkd->bqk"}> : () -> ()
    %cst_13 = arith.constant dense<0.000000e+00> : vector<2x8x8xf32>
    %17 = tpu.matmul %15, %16, %cst_13 {dimension_numbers = #tpu.dot_dimension_numbers<[2], [2], [1], [1], [0, 0, 0, 1, 1, 1], [0], [0]>} : vector<2x8x8xbf16>, vector<2x8x8xbf16>, vector<2x8x8xf32> -> vector<2x8x8xf32>
    "tpu.trace_stop"() : () -> ()
    %cst_14 = arith.constant dense<0xFF800000> : vector<8x8xf32>
    %18 = vector.multi_reduction <maximumf>, %17, %cst_14 [0] : vector<2x8x8xf32> to vector<8x8xf32>
    %19 = vector.shape_cast %18 : vector<8x8xf32> to vector<1x8x8xf32>
    %20 = vector.broadcast %19 : vector<1x8x8xf32> to vector<2x8x8xf32>
    %21 = arith.subf %17, %20 : vector<2x8x8xf32>
    %22 = math.exp %21 : vector<2x8x8xf32>
    %cst_15 = arith.constant dense<0.000000e+00> : vector<8x8xf32>
    %23 = vector.multi_reduction <add>, %22, %cst_15 [0] : vector<2x8x8xf32> to vector<8x8xf32>
    %24 = vector.shape_cast %23 : vector<8x8xf32> to vector<1x8x8xf32>
    %25 = tpu.reciprocal %24 {approx = true} : vector<1x8x8xf32> -> vector<1x8x8xf32>
    %26 = vector.broadcast %25 : vector<1x8x8xf32> to vector<2x8x8xf32>
    %27 = arith.mulf %22, %26 : vector<2x8x8xf32>
    %28 = math.exp %27 : vector<2x8x8xf32>
    %c0_16 = arith.constant 0 : index
    %c0_17 = arith.constant 0 : index
    %c0_18 = arith.constant 0 : index
    %29 = vector.load %arg2[%c0_16, %c0_17, %c0_18] : memref<2x8x8xi8, #tpu.memory_space<vmem>>, vector<2x8x8xi8>
    %30 = arith.sitofp %29 : vector<2x8x8xi8> to vector<2x8x8xf32>
    %31 = arith.mulf %28, %30 : vector<2x8x8xf32>
    %cst_19 = arith.constant dense<0.000000e+00> : vector<2x8xf32>
    %32 = vector.multi_reduction <add>, %31, %cst_19 [1] : vector<2x8x8xf32> to vector<2x8xf32>
    %33 = vector.shape_cast %32 : vector<2x8xf32> to vector<2x1x8xf32>
    %34 = tpu.reciprocal %33 {approx = true} : vector<2x1x8xf32> -> vector<2x1x8xf32>
    %35 = vector.broadcast %34 : vector<2x1x8xf32> to vector<2x8x8xf32>
    %36 = arith.mulf %31, %35 : vector<2x8x8xf32>
    %c0_20 = arith.constant 0 : index
    %c0_21 = arith.constant 0 : index
    %c0_22 = arith.constant 0 : index
    %37 = vector.load %arg8[%c0_20, %c0_21, %c0_22] : memref<2x8x16xf32, #tpu.memory_space<vmem>>, vector<2x8x16xf32>
    %38 = arith.truncf %36 : vector<2x8x8xf32> to vector<2x8x8xbf16>
    "tpu.trace_start"() <{level = 10 : i32, message = "bqk,bkf->bqf"}> : () -> ()
    %cst_23 = arith.constant dense<0.000000e+00> : vector<2x8x16xf32>
    %39 = tpu.matmul %38, %4, %cst_23 {dimension_numbers = #tpu.dot_dimension_numbers<[2], [1], [1], [2], [0, 0, 0, 1, 1, 2], [0], [0]>} : vector<2x8x8xbf16>, vector<2x8x16xbf16>, vector<2x8x16xf32> -> vector<2x8x16xf32>
    "tpu.trace_stop"() : () -> ()
    %40 = arith.addf %37, %39 : vector<2x8x16xf32>
    %c0_24 = arith.constant 0 : index
    %c0_25 = arith.constant 0 : index
    %c0_26 = arith.constant 0 : index
    %41 = vector.load %arg8[%c0_24, %c0_25, %c0_26] : memref<2x8x16xf32, #tpu.memory_space<vmem>>, vector<2x8x16xf32>
    tpu.vector_store %arg8[%c0_24, %c0_25, %c0_26], %40 {strides = array<i32>} : memref<2x8x16xf32, #tpu.memory_space<vmem>>, vector<2x8x16xf32>,
    %c0_i32_27 = arith.constant 0 : i32
    %42 = arith.cmpi eq, %arg1, %c0_i32_27 : i32
    %43 = arith.extui %42 : i1 to i32
    %c0_i32_28 = arith.constant 0 : i32
    %44 = arith.cmpi ne, %43, %c0_i32_28 : i32
    scf.if %44 {
      %c0_29 = arith.constant 0 : index
      %c0_30 = arith.constant 0 : index
      %c0_31 = arith.constant 0 : index
      %45 = vector.load %arg8[%c0_29, %c0_30, %c0_31] : memref<2x8x16xf32, #tpu.memory_space<vmem>>, vector<2x8x16xf32>
      %46 = vector.shape_cast %45 : vector<2x8x16xf32> to vector<16x16xf32>
      %47 = arith.truncf %46 : vector<16x16xf32> to vector<16x16xbf16>
      %cst_32 = arith.constant dense<0.000000e+00> : vector<16x8xf32>
      %48 = tpu.matmul %47, %8, %cst_32 {dimension_numbers = #tpu.dot_dimension_numbers<[1], [0], [0], [1], [0, 0, 1, 1], [], []>} : vector<16x16xbf16>, vector<16x8xbf16>, vector<16x8xf32> -> vector<16x8xf32>
      %49 = vector.shape_cast %48 : vector<16x8xf32> to vector<2x8x8xf32>
      %cst_33 = arith.constant dense<0xFF800000> : vector<2x8xf32>
      %50 = vector.multi_reduction <maximumf>, %49, %cst_33 [1] : vector<2x8x8xf32> to vector<2x8xf32>
      %51 = vector.shape_cast %50 : vector<2x8xf32> to vector<2x1x8xf32>
      %52 = vector.broadcast %51 : vector<2x1x8xf32> to vector<2x8x8xf32>
      %53 = arith.subf %49, %52 : vector<2x8x8xf32>
      %54 = math.exp %53 : vector<2x8x8xf32>
      %cst_34 = arith.constant dense<0.000000e+00> : vector<2x8xf32>
      %55 = vector.multi_reduction <add>, %54, %cst_34 [1] : vector<2x8x8xf32> to vector<2x8xf32>
      %56 = vector.shape_cast %55 : vector<2x8xf32> to vector<2x1x8xf32>
      %57 = vector.broadcast %56 : vector<2x1x8xf32> to vector<2x8x8xf32>
      %58 = arith.divf %54, %57 : vector<2x8x8xf32>
      %c0_35 = arith.constant 0 : index
      %c0_36 = arith.constant 0 : index
      %c0_37 = arith.constant 0 : index
      %c0_38 = arith.constant 0 : index
      %59 = vector.load %arg7[%c0_35, %c0_36, %c0_37, %c0_38] : memref<1x2x8x8xf32, #tpu.memory_space<vmem>>, vector<1x2x8x8xf32>
      %60 = vector.shape_cast %59 : vector<1x2x8x8xf32> to vector<2x8x8xf32>
      %61 = vector.shape_cast %58 : vector<2x8x8xf32> to vector<1x2x8x8xf32>
      tpu.vector_store %arg7[%c0_35, %c0_36, %c0_37, %c0_38], %61 {strides = array<i32>} : memref<1x2x8x8xf32, #tpu.memory_space<vmem>>, vector<1x2x8x8xf32>,
    } else {
    }
    return
  }
  func.func @transform_0(%arg0: i32, %arg1: i32) -> (i32, i32, i32) {
    %c0_i32 = arith.constant 0 : i32
    %c0_i32_0 = arith.constant 0 : i32
    %c0_i32_1 = arith.constant 0 : i32
    return %c0_i32, %c0_i32_0, %arg1 : i32, i32, i32
  }
  func.func @transform_1(%arg0: i32, %arg1: i32) -> (i32, i32, i32) {
    %c0_i32 = arith.constant 0 : i32
    %c0_i32_0 = arith.constant 0 : i32
    %c0_i32_1 = arith.constant 0 : i32
    %c0_i32_2 = arith.constant 0 : i32
    return %c0_i32, %c0_i32_0, %c0_i32_1 : i32, i32, i32
  }
  func.func @transform_2(%arg0: i32, %arg1: i32) -> (i32, i32, i32) {
    %c0_i32 = arith.constant 0 : i32
    %c0_i32_0 = arith.constant 0 : i32
    %c0_i32_1 = arith.constant 0 : i32
    return %c0_i32, %arg1, %c0_i32_0 : i32, i32, i32
  }
  func.func @transform_3(%arg0: i32, %arg1: i32) -> (i32, i32, i32) {
    %c0_i32 = arith.constant 0 : i32
    %c0_i32_0 = arith.constant 0 : i32
    %c0_i32_1 = arith.constant 0 : i32
    return %arg0, %c0_i32, %c0_i32_0 : i32, i32, i32
  }
  func.func @transform_4(%arg0: i32, %arg1: i32) -> (i32, i32, i32) {
    %c0_i32 = arith.constant 0 : i32
    %c0_i32_0 = arith.constant 0 : i32
    %c0_i32_1 = arith.constant 0 : i32
    return %arg0, %c0_i32, %c0_i32_0 : i32, i32, i32
  }
  func.func @transform_5(%arg0: i32, %arg1: i32) -> (i32, i32, i32, i32) {
    %c0_i32 = arith.constant 0 : i32
    %c0_i32_0 = arith.constant 0 : i32
    %c0_i32_1 = arith.constant 0 : i32
    %c0_i32_2 = arith.constant 0 : i32
    return %arg0, %c0_i32, %c0_i32_0, %c0_i32_1 : i32, i32, i32, i32
  }
}

</mosaic_0001>

<bundles_post_ra>
// kernel: tpu_custom_call.1
= control target key start
LH: loop header
LB: loop body
LE: loop exit
PB: predicated region body
PF: predicated region fallthrough
CT: control target
= control target key end

     0   :  { %10 = vsyncpa [#allocation4], 0  ;;  %s1348_s0 = inlined_call_operand.vmem [shape: s8[2,8,8], index: 0, kind: input, shape index: {}]   ;;  %s1349_s1 = inlined_call_operand.vmem [shape: bf16[2,8,16], index: 1, kind: input, shape index: {}]   ;;  %s1350_s2 = inlined_call_operand.vmem [shape: bf16[2,8,16], index: 2, kind: input, shape index: {}]   ;;  %s1351_s3 = inlined_call_operand.vmem [shape: bf16[2,16,8], index: 3, kind: input, shape index: {}]   ;;  %s1352_s4 = inlined_call_operand.vmem [shape: bf16[2,16,8], index: 4, kind: input, shape index: {}]   ;;  %s1353_s5 = inlined_call_operand.hbm [shape: f32[2,2,8,8], index: 5, kind: output, shape index: {}]  }
   0x1   :  { %12 = vsyncpa [#allocation4 + $0x1], 0  ;;  %s1166_s18 = smov 0   ;;  %s1168_s19 = smov 0  }
   0x2   :  { %s1170_s20 = smov 0   ;;  %s1172_s21 = smov 0  }
   0x3   :  { %s1174_s22 = smov 0   ;;  %s1176_s23 = smov 0  }
   0x4 LB: > { %s875_s24 = sadd.s32 4294967295, %s1129_s23   ;;  %s876_s25 = sadd.s32 4294967294, %s1129_s23   ;;  %s1129_s23 = sphi %s1176_s23, %s18_s23   ;;  %s1125_s22 = sphi %s1174_s22, %s1360_s22   ;;  %s1121_s21 = sphi %s1172_s21, %s1359_s21   ;;  %s1117_s20 = sphi %s1170_s20, %s1358_s20   ;;  %s1113_s19 = sphi %s1168_s19, %s1357_s19   ;;  %s1109_s18 = sphi %s1166_s18, %s1356_s18  }
   0x5   : > { %s30_s26 = sadd.s32 1, %s1125_s22  ;;  %s162_s27 = sadd.s32 1, %s1117_s20 }
   0x6   : > { %p32_p0 = scmp.ge.s32.totalorder %s30_s26, 2  ;;  %p172_p1 = scmp.ne.s32.totalorder %s1117_s20, %s1113_s19 }
   0x7   : > { %p173_p2 = scmp.eq.s32.totalorder %s875_s24, 1  ;;  %p178_p3 = scmp.ne.s32.totalorder %s1113_s19, %s1109_s18 }
   0x8   : > { %s1362_s26 = smov (%p32_p0, %s30_s26), 0  ;;  %p179_p5 = scmp.eq.s32.totalorder %s876_s25, 1 }
   0x9   : > { %p1206_p4 = por %p173_p2, %p172_p1  ;;  %s159_s29 = ssub.s32 %s1125_s22, %s1362_s26 }
   0xa   : > { %p881_p6 = scmp.ge.s32.totalorder %s1129_s23, 1  ;;  %p160_p7 = scmp.eq.s32.totalorder %s159_s29, 0 }
   0xb   : > { %p1213_p8 = por %p179_p5, %p178_p3  ;;  %p230_p9 = scmp.lt.s32.totalorder %s1129_s23, 3 }
   0xc   : > { %s1219_s6 = scalar_select %p160_p7, %s1117_s20, %s162_s27  }
   0xd   : > { %p231_p10 = pnand %p881_p6, %p230_p9 }
   0xe   : > { %p279_p11 = scmp.lt.s32.totalorder (!%p231_p10), %s1121_s21, 1  ;;  %vm294_vm0 = vcmask (!%p231_p10), 130048   ;;  %v1131_v0 = vmov (!%p231_p10), 0.0   ;;  %vm1132_vm1 = vmmov (!%p231_p10), 0   ;;  %v299_v1 = vld [vmem:[%s1350_s2] sm:$0xf] (!%p231_p10) }
   0xf   : > { %234 = sbr.rel (%p231_p10) target bundleno = 1052 (0x41c), region = 40  ;;  %930 = vmatprep.subr.bf16.mxu1 (!%p231_p10), %v1131_v0  ;;  %932 = vmatprep.mubr.msk.bf16.mxu1 (!%p231_p10), %vm1132_vm1, %v1131_v0  ;;  %295 = vst.msk [vmem:[#allocation2] sm:$0xff] (!%p231_p10), %vm294_vm0, %v1131_v0  ;;  %296 = vst.msk [vmem:[#allocation2 + $0x8] sm:$0xff] (!%p231_p10), %vm294_vm0, %v1131_v0  ;;  %v300_v2 = vld [vmem:[%s1350_s2 + $0x4] sm:$0xf] (!%p231_p10)  ;;  %vm420_vm2 = vcmask (!%p231_p10), 64512  }
  0x10   : > { %924 = vmatprep.subr.bf16.mxu0 (!%p231_p10), %v1131_v0  ;;  %926 = vmatprep.mubr.msk.bf16.mxu0 (!%p231_p10), %vm1132_vm1, %v1131_v0  ;;  %v890_v4 = vcombine.low (!%p231_p10), %v299_v1, %v300_v2  ;;  %v1028_v6 = vld [vmem:[%s1349_s1] sm:$0xff] (!%p231_p10)   ;;  %vm565_vm3 = vcmask (!%p231_p10), 1043456   ;;  %s905_s10 = sshll.u32 (!%p231_p10), %s1121_s21, 8  ;;  %s1133_s17 = smov (!%p231_p10), [#allocation3]  }
  0x11   : > { %v567_v21 = vsel (!%p231_p10), %vm565_vm3, %v299_v1, 0  ;;  %v613_v22 = vsel (!%p231_p10), %vm565_vm3, %v300_v2, 0  ;;  %v907_v48 = vld [vmem:[%s1348_s0] sm:$0xf] (!%p231_p10)  }
  0x12   : > { %v908_v49 = vunpack.c.0.s8 (!%p231_p10), %v907_v48  ;;  %v909_v50 = vunpack.c.1.s8 (!%p231_p10), %v907_v48 }
  0x14   : > { %v536_v51 = vcvt.s32.f32 (!%p231_p10), %v908_v49  ;;  %v537_v52 = vcvt.s32.f32 (!%p231_p10), %v909_v50 }
  0x16   : > { %s280_s7 = scalar_select %p279_p11, %s1121_s21, 1 }
  0x18   : > { %s903_s8 = sshll.u32 %s280_s7, 3 }
  0x19   : > { %s288_s15 = scalar_lea.vmem %s1352_s4, %s903_s8  ;;  %s283_s24 = scalar_lea.vmem %s1351_s3, %s903_s8 }
  0x1a   : > { %v1245_v3 = vld [vmem:[%s288_s15] sm:$0xff]   ;;  %s268_s8 = sand.u32 1, %s1113_s19   ;;  %s1296_s15 = scalar_lea.hbm %s1353_s5, %s905_s10 }
  0x1b   : > { %v1027_v5 = vld [vmem:[%s283_s24] sm:$0xff]   ;;  %931 = vmatpush3.bf16.msra.mxu1 %v1245_v3  ;;  %s882_s9 = sshll.u32 %s268_s8, 4  ;;  %s1302_s21 = scalar_lea.sflag [#allocation4], %s268_s8 }
  0x1c   : > { %925 = vmatpush3.bf16.msra.mxu0 %v1027_v5  ;;  %942 = vmatprep.subr.bf16.mxu1 %v1131_v0  ;;  %s270_s11 = scalar_lea.vmem [#allocation3], %s882_s9  ;;  %s1055_s24 = sshll.u32 %s1133_s17, 4  ;;  %s1056_s24 = int_to_ptr.vmem [resolvable:$false] %s1055_s24 }
  0x1d   : > { %936 = vmatprep.subr.bf16.mxu0 %v1131_v0  ;;  %s763_s12 = sshll.u32 %s270_s11, 4  ;;  %s1057_s25 = scalar_lea.vmem %s1056_s24, 512  ;;  %s1298_s12 = int_to_ptr.vmem [resolvable:$true] %s763_s12 }
  0x1e   : > { %933 = vmatmul.mubr.msk.bf16.vlgmr.msra.gmra.mrb[0].mxu1 %vm294_vm0, %v890_v4  ;;  %s1051_s16 = scalar_lea.vmem %s1298_s12, 256  ;;  %p1058_p1 = scmp.lt.s32.totalorder %s1298_s12, %s1056_s24 }
  0x1f   : > { %927 = vmatmul.mubr.msk.bf16.vlgmr.msra.gmra.mrb[0].mxu0 %vm294_vm0, %v1028_v6  ;;  %944 = vmatprep.mubr.msk.bf16.mxu1 %vm1132_vm1, %v1131_v0  ;;  %p1052_p12 = scmp.ne.s32.totalorder %s1298_s12, %s1051_s16  ;;  %p1059_p2 = scmp.lt.s32.totalorder %s1057_s25, %s1051_s16 }
  0x20   : > { %938 = vmatprep.mubr.msk.bf16.mxu0 %vm1132_vm1, %v1131_v0 }
  0x21   : > { %p1053_p13 = pnand %p1052_p12, %p1206_p4  ;;  %p1060_p3 = por %p1059_p2, %p1058_p1 }
  0x23   : > { %p1054_p0 = pneg %p1053_p13 }
  0x25   : > { %p1061_p5 = pnand %p1060_p3, %p1054_p0 }
  0xf1   : > { %v409_v7 = vpop.f32.mrb[0].mxu1 }
  0xf2   : > { %v418_v8 = vpack.c.bf16 %v409_v7, %v409_v7  ;;  %v934_v9 = vpop.f32.mrb[1].mxu1  ;;  %v354_v10 = vpop.f32.mrb[0].mxu0 }
  0xf3   : > { %v412_v11 = vpop.f32.mrb[2].mxu1  ;;  %v928_v12 = vpop.f32.mrb[1].mxu0  ;;  %v416_v19 = vpack.c.bf16 %v354_v10, %v354_v10 }
  0xf4   : > { %v425_v13 = vsel %vm420_vm2, %v418_v8, 0  ;;  %v419_v14 = vpack.c.bf16 %v412_v11, %v412_v11  ;;  %v935_v15 = vpop.f32.mrb[3].mxu1  ;;  %v357_v16 = vpop.f32.mrb[2].mxu0 }
  0xf5   : > { %937 = vmatpush3.bf16.xpose.msra.mxu0 %v425_v13  ;;  %v929_v17 = vpop.f32.mrb[3].mxu0  ;;  %v417_v20 = vpack.c.bf16 %v357_v16, %v357_v16  ;;  %v558_v15 = vld [vmem:[#allocation2] sm:$0xff]  ;;  %v559_v16 = vld [vmem:[#allocation2 + $0x8] sm:$0xff] }
  0xf6   : > { %v471_v18 = vsel %vm420_vm2, %v419_v14, 0  ;;  %948 = vmatprep.subr.bf16.mxu0 %v1131_v0 }
  0xf7   : > { %943 = vmatpush3.bf16.xpose.msra.mxu1 %v471_v18 }
  0xf8   : > { %954 = vmatprep.subr.bf16.mxu1 %v1131_v0 }
  0xfc   : > { %939 = vmatmul.mubr.msk.bf16.vlgmr.msra.gmra.mrb[4].mxu0 %vm420_vm2, %v416_v19 }
  0xfd   : > { %950 = vmatprep.mubr.msk.bf16.mxu0 %vm1132_vm1, %v1131_v0  ;;  %949 = vmatpush3.bf16.msra.mxu0 %v567_v21 }
  0xfe   : > { %945 = vmatmul.mubr.msk.bf16.vlgmr.msra.gmra.mrb[4].mxu1 %vm420_vm2, %v417_v20  ;;  %960 = vmatprep.subr.bf16.mxu0 %v1131_v0 }
  0xff   : > { %956 = vmatprep.mubr.msk.bf16.mxu1 %vm1132_vm1, %v1131_v0  ;;  %955 = vmatpush3.bf16.msra.mxu1 %v613_v22 }
 0x1cf   : > { %v461_v23 = vpop.f32.mrb[4].mxu0 }
 0x1d0   : > { %v940_v24 = vpop.f32.mrb[5].mxu0  ;;  %v513_v27 = vsel %vm420_vm2, %v461_v23, -inf }
 0x1d1   : > { %v464_v25 = vpop.f32.mrb[6].mxu0  ;;  %v507_v26 = vpop.f32.mrb[4].mxu1 }
 0x1d2   : > { %v514_v28 = vsel %vm420_vm2, %v507_v26, -inf  ;;  %v941_v29 = vpop.f32.mrb[7].mxu0  ;;  %v946_v30 = vpop.f32.mrb[5].mxu1 }
 0x1d3   : > { %v515_v31 = vmax.f32 %v513_v27, %v514_v28  ;;  %v510_v32 = vpop.f32.mrb[6].mxu1 }
 0x1d4   : > { %v947_v33 = vpop.f32.mrb[7].mxu1 }
 0x1d5   : > { %v516_v34 = vsub.f32 %v461_v23, %v515_v31  ;;  %v517_v35 = vsub.f32 %v507_v26, %v515_v31 }
 0x1d7   : > { %v518_v36 = vmul.f32 1.442695, %v516_v34  ;;  %v520_v37 = vmul.f32 1.442695, %v517_v35 }
 0x1d9   : > { %1029 = vpow2.f32 %v518_v36 }
 0x1da   : > { %1031 = vpow2.f32 %v520_v37 }
 0x1e3   : > { %v1030_v38 = vpop.eup %1029 }
 0x1e4   : > { %v1032_v39 = vpop.eup %1031  ;;  %v522_v40 = vsel %vm420_vm2, %v1030_v38, 0.0 }
 0x1e5   : > { %v523_v41 = vsel %vm420_vm2, %v1032_v39, 0.0 }
 0x1e6   : > { %v524_v42 = vadd.f32 %v523_v41, %v522_v40 }
 0x1e8   : > { %1033 = vrcp.f32 %v524_v42 }
 0x1f2   : > { %v1034_v43 = vpop.eup %1033 }
 0x1f3   : > { %v526_v44 = vmul.f32 %v1034_v43, %v1030_v38  ;;  %v527_v45 = vmul.f32 %v1034_v43, %v1032_v39 }
 0x1f5   : > { %v528_v46 = vmul.f32 1.442695, %v526_v44  ;;  %v530_v47 = vmul.f32 1.442695, %v527_v45 }
 0x1f7   : > { %1035 = vpow2.f32 %v528_v46 }
 0x1f8   : > { %1037 = vpow2.f32 %v530_v47 }
 0x201   : > { %v1036_v53 = vpop.eup %1035 }
 0x202   : > { %v1038_v54 = vpop.eup %1037  ;;  %v538_v55 = vmul.f32 %v1036_v53, %v536_v51 }
 0x203   : > { %v539_v56 = vmul.f32 %v1038_v54, %v537_v52 }
 0x204   : > { %v540_v57 = vsel %vm420_vm2, %v538_v55, 0.0 }
 0x205   : > { %v541_v58 = vrot.slane %v540_v57, 4  ;;  %v547_v59 = vsel %vm420_vm2, %v539_v56, 0.0 }
 0x206   : > { %v548_v60 = vrot.slane %v547_v59, 4 }
 0x207   : > { %v542_v61 = vadd.f32 %v541_v58, %v540_v57 }
 0x208   : > { %v549_v62 = vadd.f32 %v548_v60, %v547_v59 }
 0x209   : > { %v543_v63 = vrot.slane %v542_v61, 2 }
 0x20a   : > { %v550_v1 = vrot.slane %v549_v62, 2 }
 0x20b   : > { %v544_v2 = vadd.f32 %v543_v63, %v542_v61 }
 0x20c   : > { %v551_v4 = vadd.f32 %v550_v1, %v549_v62 }
 0x20d   : > { %v545_v5 = vrot.slane %v544_v2, 1 }
 0x20e   : > { %v552_v6 = vrot.slane %v551_v4, 1 }
 0x20f   : > { %v546_v7 = vadd.f32 %v545_v5, %v544_v2 }
 0x210   : > { %v553_v8 = vadd.f32 %v552_v6, %v551_v4 }
 0x211   : > { %1039 = vrcp.f32 %v546_v7 }
 0x212   : > { %1041 = vrcp.f32 %v553_v8 }
 0x21b   : > { %v1040_v9 = vpop.eup %1039 }
 0x21c   : > { %v1042_v10 = vpop.eup %1041  ;;  %v556_v11 = vmul.f32 %v1040_v9, %v538_v55 }
 0x21d   : > { %v557_v12 = vmul.f32 %v1042_v10, %v539_v56 }
 0x21e   : > { %v560_v13 = vpack.c.bf16 %v556_v11, %v556_v11 }
 0x21f   : > { %v561_v14 = vpack.c.bf16 %v557_v12, %v557_v12 }
 0x220   : > { %951 = vmatmul.mubr.msk.bf16.vlgmr.msra.gmra.mrb[8].mxu0 %vm420_vm2, %v560_v13 }
 0x221   : > { %957 = vmatmul.mubr.msk.bf16.vlgmr.msra.gmra.mrb[8].mxu1 %vm420_vm2, %v561_v14  ;;  %961 = vmatpush3.bf16.msra.mxu0 %v1245_v3 }
 0x222   : > { %962 = vmatprep.mubr.msk.bf16.mxu0 %vm1132_vm1, %v1131_v0 }
 0x2f3   : > { %v603_v17 = vpop.f32.mrb[8].mxu0 }
 0x2f4   : > { %v655_v18 = vadd.f32 %v603_v17, %v558_v15  ;;  %v649_v19 = vpop.f32.mrb[8].mxu1  ;;  %v952_v20 = vpop.f32.mrb[9].mxu0 }
 0x2f5   : > { %v656_v21 = vadd.f32 %v649_v19, %v559_v16  ;;  %v958_v22 = vpop.f32.mrb[9].mxu1  ;;  %v606_v23 = vpop.f32.mrb[10].mxu0 }
 0x2f6   : > { %657 = vst.msk [vmem:[#allocation2] sm:$0xff] %vm294_vm0, %v655_v18  ;;  %v652_v24 = vpop.f32.mrb[10].mxu1  ;;  %v953_v25 = vpop.f32.mrb[11].mxu0 }
 0x2f7   : > { %658 = vst.msk [vmem:[#allocation2 + $0x8] sm:$0xff] %vm294_vm0, %v656_v21  ;;  %v959_v26 = vpop.f32.mrb[11].mxu1 }
 0x2fd   : > { %v662_v3 = vld [vmem:[#allocation2] sm:$0xff] }
 0x2fe   : > { %v663_v27 = vld [vmem:[#allocation2 + $0x8] sm:$0xff] }
 0x2ff   : > { %v664_v28 = vpack.c.bf16 %v663_v27, %v662_v3 }
 0x301   : > { %963 = vmatmul.mubr.msk.bf16.vlgmr.msra.gmra.mrb[12].mxu0 %vm294_vm0, %v664_v28 }
 0x3d4   : > { %v702_v0 = vpop.f32.mrb[12].mxu0 }
 0x3d5   : > { %v709_v29 = vsel %vm420_vm2, %v702_v0, -inf  ;;  %v964_v30 = vpop.f32.mrb[13].mxu0 }
 0x3d6   : > { %v710_v31 = vrot.slane %v709_v29, 4  ;;  %v705_v32 = vpop.f32.mrb[14].mxu0 }
 0x3d7   : > { %v716_v33 = vsel %vm420_vm2, %v705_v32, -inf  ;;  %v965_v34 = vpop.f32.mrb[15].mxu0 }
 0x3d8   : > { %v711_v35 = vmax.f32 %v709_v29, %v710_v31  ;;  %v717_v36 = vrot.slane %v716_v33, 4 }
 0x3da   : > { %v712_v37 = vrot.slane %v711_v35, 2  ;;  %v718_v38 = vmax.f32 %v716_v33, %v717_v36 }
 0x3dc   : > { %v713_v39 = vmax.f32 %v711_v35, %v712_v37  ;;  %v719_v40 = vrot.slane %v718_v38, 2 }
 0x3de   : > { %v714_v41 = vrot.slane %v713_v39, 1  ;;  %v720_v42 = vmax.f32 %v718_v38, %v719_v40 }
 0x3e0   : > { %v715_v43 = vmax.f32 %v713_v39, %v714_v41  ;;  %v721_v44 = vrot.slane %v720_v42, 1 }
 0x3e2   : > { %v723_v45 = vsub.f32 %v702_v0, %v715_v43  ;;  %v722_v46 = vmax.f32 %v720_v42, %v721_v44 }
 0x3e4   : > { %v725_v47 = vmul.f32 1.442695, %v723_v45  ;;  %v724_v48 = vsub.f32 %v705_v32, %v722_v46 }
 0x3e6   : > { %1043 = vpow2.f32 %v725_v47  ;;  %v727_v49 = vmul.f32 1.442695, %v724_v48 }
 0x3e8   : > { %1045 = vpow2.f32 %v727_v49 }
 0x3f0   : > { %v1044_v50 = vpop.eup %1043 }
 0x3f1   : > { %v729_v51 = vsel %vm420_vm2, %v1044_v50, 0.0 }
 0x3f2   : > { %v1046_v52 = vpop.eup %1045  ;;  %v730_v53 = vrot.slane %v729_v51, 4 }
 0x3f3   : > { %v736_v54 = vsel %vm420_vm2, %v1046_v52, 0.0 }
 0x3f4   : > { %v731_v55 = vadd.f32 %v730_v53, %v729_v51  ;;  %v737_v56 = vrot.slane %v736_v54, 4 }
 0x3f6   : > { %v732_v57 = vrot.slane %v731_v55, 2  ;;  %v738_v58 = vadd.f32 %v737_v56, %v736_v54 }
 0x3f8   : > { %v733_v59 = vadd.f32 %v732_v57, %v731_v55  ;;  %v739_v60 = vrot.slane %v738_v58, 2 }
 0x3fa   : > { %v734_v61 = vrot.slane %v733_v59, 1  ;;  %v740_v62 = vadd.f32 %v739_v60, %v738_v58 }
 0x3fc   : > { %v735_v63 = vadd.f32 %v734_v61, %v733_v59  ;;  %v741_v1 = vrot.slane %v740_v62, 1 }
 0x3fe   : > { %1047 = vrcp.f32 %v735_v63  ;;  %v742_v2 = vadd.f32 %v741_v1, %v740_v62 }
 0x400   : > { %1049 = vrcp.f32 %v742_v2 }
 0x408   : > { %v1048_v4 = vpop.eup %1047 }
 0x409   : > { %v744_v5 = vmul.f32 %v1048_v4, %v1044_v50 }
 0x40a   : > { %v1050_v6 = vpop.eup %1049 }
 0x40b   : > { %v746_v7 = vmul.f32 %v1050_v6, %v1046_v52  ;;  %747 = vst.msk [vmem:[%s270_s11] sm:$0xff] %vm420_vm2, %v744_v5 }
 0x40d   : > { %748 = vst.msk [vmem:[%s270_s11 + $0x8] sm:$0xff] %vm420_vm2, %v746_v7 }
 0x40e   : > { %1064 = shalt.err (!%p1061_p5)
}
 0x40f   : > { %s1065_s27 = scalar_lea.hbm %s1296_s15, 256  ;;  %s1069_s8 = scalar_lea.hbm %s1353_s5, 512 }
 0x410   : > { %p1066_p6 = scmp.ne.s32.totalorder %s1296_s15, %s1065_s27  ;;  %p1070_p10 = scmp.lt.u32.totalorder %s1296_s15, %s1353_s5 }
 0x411   : > { %p1071_p11 = scmp.lt.u32.totalorder %s1069_s8, %s1065_s27  ;;  %p1073_p13 = scmp.lt.u32.totalorder %s1065_s27, %s1296_s15 }
 0x412   : > { %p1067_p7 = pnand %p1066_p6, %p1206_p4 }
 0x413   : > { %p1072_p12 = por %p1071_p11, %p1070_p10 }
 0x414   : > { %p1068_p9 = pneg %p1067_p7 }
 0x415   : > { %p1074_p0 = por %p1073_p13, %p1072_p12 }
 0x417   : > { %p1075_p1 = pnand %p1074_p0, %p1068_p9 }
 0x419   : > { %1078 = shalt.err (!%p1075_p1)
}
 0x41a   : > { %s1134_s11 = smov 128   ;;  %s1135_s13 = smov 8  }
 0x41b   : > { %966 = dma.vmem_to_hbm [thread:$0]  (%p1206_p4), %s1298_s12, 256, %s1296_s15, %s1302_s21, %s1134_s11, %s1134_s11, %s1135_s13  }
 0x41c PF: > { %p972_p2 = scmp.ge.s32.totalorder %s1129_s23, 2  ;;  %s778_s14 = sand.u32 1, %s1109_s18  }
 0x41d   : > { %s779_s16 = scalar_lea.sflag [#allocation4], %s778_s14 }
 0x41e   : > { %p969_p3 = pnand %p972_p2, %p1213_p8 }
 0x420   : > { %1104 = dma.done.wait (!%p969_p3), %s779_s16, 256  }
 0x421   : > { %1106 = vsyncadd (!%p969_p3), %s779_s16, 4294967040  ;;  %s18_s23 = sadd.s32 1, %s1129_s23   ;;  %s1356_s18 = smov %s1113_s19 }
 0x422   : > { %p15_p5 = scmp.ge.s32.totalorder %s18_s23, 4   ;;  %s1357_s19 = smov %s1117_s20 }
 0x423   : > { %s1358_s20 = smov %s1219_s6  ;;  %s1359_s21 = smov %s1125_s22 }
 0x424   : > { %s1360_s22 = smov %s1362_s26  ;;  %17 = sbr.rel (!%p15_p5) target bundleno = 4 (0x4), region = 92 }
 0x42b   :  { %784 = vsyncpa [#allocation4], 1 }
 0x42c   :  { %786 = vsyncpa [#allocation4 + $0x1], 1 }

</bundles_post_ra>
